<compile_context>
chip_gen: v5e
topology: v5e:2x2
jax: 0.10.0
libtpu: 0.0.40
codegen_flags: <defaults>
</compile_context>

<pallas_src>
import jax
import jax.numpy as jnp
from jax.experimental import pallas as pl
from jax.experimental.pallas import tpu as pltpu


def _round_up(v, m):
    return (v + m - 1) // m * m


# ----------------------------------------------------------------------------
# Pallas kernels: K-tiled matmul, f32 accumulator, fused bias (+ residual).
# grid = (M_tiles, K_tiles); M axis "parallel", K axis "arbitrary" (reduction,
# output tile resident across it).
# ----------------------------------------------------------------------------
def _mm_bias_kernel(p_ref, w_ref, b_ref, out_ref, acc_ref):
    k = pl.program_id(1)

    @pl.when(k == 0)
    def _():
        acc_ref[...] = jnp.zeros_like(acc_ref)

    acc_ref[...] += jnp.dot(p_ref[...], w_ref[...],
                            preferred_element_type=jnp.float32)

    @pl.when(k == pl.num_programs(1) - 1)
    def _():
        out_ref[...] = (acc_ref[...] + b_ref[...]).astype(out_ref.dtype)


def _mm_bias_res_kernel(p_ref, w_ref, b_ref, res_ref, out_ref, acc_ref):
    k = pl.program_id(1)

    @pl.when(k == 0)
    def _():
        acc_ref[...] = jnp.zeros_like(acc_ref)

    acc_ref[...] += jnp.dot(p_ref[...], w_ref[...],
                            preferred_element_type=jnp.float32)

    @pl.when(k == pl.num_programs(1) - 1)
    def _():
        out_ref[...] = (acc_ref[...] + b_ref[...]
                        + res_ref[...]).astype(out_ref.dtype)


# ----------------------------------------------------------------------------
# Layout glue: K-fused im2col  (N,H,W,C) -> (M, 9*C), tap order matches the
# HWIO weight reshape (kh, kw, cin).
# ----------------------------------------------------------------------------
def _im2col_kfused(x_nhwc, stride, ho, wo, dtype):
    n, _, _, c = x_nhwc.shape
    xp = jnp.pad(x_nhwc, ((0, 0), (1, 1), (1, 1), (0, 0)))
    taps = []
    for kh in range(3):
        for kw in range(3):
            p = jax.lax.slice(
                xp,
                (0, kh, kw, 0),
                (n, kh + stride * (ho - 1) + 1, kw + stride * (wo - 1) + 1, c),
                (1, stride, stride, 1))
            taps.append(p.reshape(n * ho * wo, c))
    return jnp.concatenate(taps, axis=-1).astype(dtype)     # (M, 9*C)


def conv3x3_pallas(x_nhwc, w_hwio, b, *, stride, residual_nhwc=None,
                   compute_dtype=jnp.bfloat16, tm_target=1024):
    """3x3 conv, padding=1, given stride, bias, optional fused residual add."""
    n, h, w, cin = x_nhwc.shape
    cout = w_hwio.shape[-1]
    ho = (h + 2 - 3) // stride + 1
    wo = (w + 2 - 3) // stride + 1
    m = n * ho * wo
    kdim = 9 * cin

    patches = _im2col_kfused(x_nhwc, stride, ho, wo, compute_dtype)  # (M, 9*Cin)
    wmat = w_hwio.reshape(kdim, cout).astype(compute_dtype)          # (9*Cin, Cout)
    bmat = b.reshape(1, cout).astype(jnp.float32)

    # --- tiling ------------------------------------------------------------
    # M tile: multiple of 8, capped; M padded up to a tile multiple.
    tm = min(tm_target, _round_up(m, 8))
    m_pad = _round_up(m, tm)
    # K tile: largest lane-aligned divisor of 9*Cin (falls back to full K,
    # which is allowed since the block then equals the array dim).
    tk = kdim
    for cand in (1152, 768, 512, 384, 256, 128):
        if kdim % cand == 0:
            tk = cand
            break

    if m_pad != m:
        patches = jnp.pad(patches, ((0, m_pad - m), (0, 0)))

    in_specs = [
        pl.BlockSpec((tm, tk), lambda i, k: (i, k)),        # patches
        pl.BlockSpec((tk, cout), lambda i, k: (k, 0)),      # weights
        pl.BlockSpec((1, cout), lambda i, k: (0, 0)),       # bias
    ]
    args = [patches, wmat, bmat]

    if residual_nhwc is not None:
        res = residual_nhwc.reshape(m, cout).astype(jnp.float32)
        if m_pad != m:
            res = jnp.pad(res, ((0, m_pad - m), (0, 0)))
        in_specs.append(pl.BlockSpec((tm, cout), lambda i, k: (i, 0)))
        args.append(res)
        kernel = _mm_bias_res_kernel
    else:
        kernel = _mm_bias_kernel

    out = pl.pallas_call(
        kernel,
        out_shape=jax.ShapeDtypeStruct((m_pad, cout), jnp.float32),
        grid_spec=pltpu.PrefetchScalarGridSpec(
            num_scalar_prefetch=0,
            grid=(m_pad // tm, kdim // tk),
            in_specs=in_specs,
            out_specs=pl.BlockSpec((tm, cout), lambda i, k: (i, 0)),
            scratch_shapes=[pltpu.VMEM((tm, cout), jnp.float32)],
        ),
        compiler_params=pltpu.CompilerParams(
            dimension_semantics=("parallel", "arbitrary"),
            vmem_limit_bytes=48 * 1024 * 1024),
    )(*args)

    return out[:m].reshape(n, ho, wo, cout)


# ----------------------------------------------------------------------------
# Bottom2UP forward (USE_GN=False path) + LastLevelMaxPool top block.
# ----------------------------------------------------------------------------
def bottom2up_forward(xs_nchw, params):
    """xs_nchw: list of NCHW feature maps, highest resolution first.
    params: list of (w1, b1, w2, b2) per backbone stage (HWIO weights)."""
    # NCHW -> NHWC at the boundary
    xs = [jnp.transpose(x, (0, 2, 3, 1)) for x in xs_nchw]

    last_feature = xs[0]
    results = [last_feature]
    for i, (w1, b1, w2, b2) in enumerate(params):
        if i + 1 >= len(xs):
            break
        feature = xs[i + 1]
        # inner = conv1(last); last = feature + inner  (residual fused in kernel)
        last_feature = conv3x3_pallas(last_feature, w1, b1, stride=2,
                                      residual_nhwc=feature)
        # last = conv2(last)  (no residual -> dedicated kernel variant)
        last_feature = conv3x3_pallas(last_feature, w2, b2, stride=1)
        results.append(last_feature)

    # LastLevelMaxPool: F.max_pool2d(x, kernel=1, stride=2, pad=0) is a pure
    # spatial subsample (no arithmetic), kept as JAX glue.
    results.append(results[-1][:, ::2, ::2, :])

    # back to NCHW to match the PyTorch module's convention
    return tuple(jnp.transpose(r, (0, 3, 1, 2)) for r in results)


# ----------------------------------------------------------------------------
# Pure-JAX reference (XLA conv, same bf16-input / f32-accumulate precision)
# for a correctness check.
# ----------------------------------------------------------------------------
def _conv_ref(x_nhwc, w_hwio, b, stride, compute_dtype=jnp.bfloat16):
    y = jax.lax.conv_general_dilated(
        x_nhwc.astype(compute_dtype), w_hwio.astype(compute_dtype),
        (stride, stride), [(1, 1), (1, 1)],
        dimension_numbers=('NHWC', 'HWIO', 'NHWC'),
        preferred_element_type=jnp.float32)
    return y + b.reshape(1, 1, 1, -1).astype(jnp.float32)


def bottom2up_ref(xs_nchw, params):
    xs = [jnp.transpose(x, (0, 2, 3, 1)) for x in xs_nchw]
    last = xs[0]
    results = [last]
    for i, (w1, b1, w2, b2) in enumerate(params):
        if i + 1 >= len(xs):
            break
        inner = _conv_ref(last, w1, b1, 2)
        last = xs[i + 1] + inner
        last = _conv_ref(last, w2, b2, 1)
        results.append(last)
    results.append(results[-1][:, ::2, ::2, :])
    return tuple(jnp.transpose(r, (0, 3, 1, 2)) for r in results)


if __name__ == "__main__":
    key = jax.random.PRNGKey(0)

    N, C = 2, 8
    num_backbone_stages = 2
    spatial = [16, 8, 4]            # len(x) = num_backbone_stages + 1

    # deterministic synthetic inputs (NCHW, highest resolution first)
    keys = jax.random.split(key, 16)
    xs = [jax.random.normal(keys[i], (N, C, s, s), jnp.float32)
          for i, s in enumerate(spatial)]

    # deterministic synthetic parameters: per stage
    #   conv1: 3x3 stride 2 pad 1, bias ; conv2: 3x3 stride 1 pad 1, bias
    params = []
    kidx = len(spatial)
    for _ in range(num_backbone_stages):
        w1 = 0.1 * jax.random.normal(keys[kidx + 0], (3, 3, C, C), jnp.float32)
        b1 = 0.1 * jax.random.normal(keys[kidx + 1], (C,), jnp.float32)
        w2 = 0.1 * jax.random.normal(keys[kidx + 2], (3, 3, C, C), jnp.float32)
        b2 = 0.1 * jax.random.normal(keys[kidx + 3], (C,), jnp.float32)
        params.append((w1, b1, w2, b2))
        kidx += 4

    outs = bottom2up_forward(xs, params)
    outs = jax.block_until_ready(outs)

    refs = bottom2up_ref(xs, params)
    refs = jax.block_until_ready(refs)

    assert len(outs) == len(spatial) + 1
    for o, r in zip(outs, refs):
        assert o.shape == r.shape, (o.shape, r.shape)
        assert jnp.allclose(o, r, atol=1e-2, rtol=1e-2), \
            float(jnp.max(jnp.abs(o - r)))

    print("KERNEL_OK")
</pallas_src>

<mosaic_0001>
module attributes {stable_mosaic.version = 11 : i64} {
  func.func @_mm_bias_res_kernel(%arg0: i32, %arg1: i32, %arg2: memref<128x72xbf16, #tpu.memory_space<vmem>>, %arg3: memref<72x8xbf16, #tpu.memory_space<vmem>>, %arg4: memref<1x8xf32, #tpu.memory_space<vmem>>, %arg5: memref<128x8xf32, #tpu.memory_space<vmem>>, %arg6: memref<128x8xf32, #tpu.memory_space<vmem>>, %arg7: memref<128x8xf32, #tpu.memory_space<vmem>>) attributes {dimension_semantics = [#tpu.dimension_semantics<parallel>, #tpu.dimension_semantics<arbitrary>], iteration_bounds = array<i64: 1, 1>, scalar_prefetch = 0 : i64, scratch_operands = 1 : i64, tpu.core_type = #tpu.core_type<tc>, window_params = [{transform_indices = @transform_0, window_bounds = array<i64: 128, 72>}, {transform_indices = @transform_1, window_bounds = array<i64: 72, 8>}, {pipeline_mode = #tpu.pipeline_mode<synchronous>, transform_indices = @transform_2, window_bounds = array<i64: 1, 8>}, {transform_indices = @transform_3, window_bounds = array<i64: 128, 8>}, {transform_indices = @transform_4, window_bounds = array<i64: 128, 8>}]} {
    %c0_i32 = arith.constant 0 : i32
    %0 = arith.cmpi eq, %arg1, %c0_i32 : i32
    %1 = arith.extui %0 : i1 to i32
    %c0_i32_0 = arith.constant 0 : i32
    %2 = arith.cmpi ne, %1, %c0_i32_0 : i32
    scf.if %2 {
      %cst_10 = arith.constant 0.000000e+00 : f32
      %12 = vector.broadcast %cst_10 : f32 to vector<128x8xf32>
      %c0_11 = arith.constant 0 : index
      %c0_12 = arith.constant 0 : index
      %13 = vector.load %arg7[%c0_11, %c0_12] : memref<128x8xf32, #tpu.memory_space<vmem>>, vector<128x8xf32>
      tpu.vector_store %arg7[%c0_11, %c0_12], %12 {strides = array<i32>} : memref<128x8xf32, #tpu.memory_space<vmem>>, vector<128x8xf32>,
    } else {
    }
    %c0 = arith.constant 0 : index
    %c0_1 = arith.constant 0 : index
    %3 = vector.load %arg7[%c0, %c0_1] : memref<128x8xf32, #tpu.memory_space<vmem>>, vector<128x8xf32>
    %c0_2 = arith.constant 0 : index
    %c0_3 = arith.constant 0 : index
    %4 = vector.load %arg2[%c0_2, %c0_3] : memref<128x72xbf16, #tpu.memory_space<vmem>>, vector<128x72xbf16>
    %c0_4 = arith.constant 0 : index
    %c0_5 = arith.constant 0 : index
    %5 = vector.load %arg3[%c0_4, %c0_5] : memref<72x8xbf16, #tpu.memory_space<vmem>>, vector<72x8xbf16>
    %cst = arith.constant dense<0.000000e+00> : vector<128x8xf32>
    %6 = tpu.matmul %4, %5, %cst {dimension_numbers = #tpu.dot_dimension_numbers<[1], [0], [0], [1], [0, 0, 1, 1], [], []>} : vector<128x72xbf16>, vector<72x8xbf16>, vector<128x8xf32> -> vector<128x8xf32>
    %7 = arith.addf %3, %6 : vector<128x8xf32>
    %c0_6 = arith.constant 0 : index
    %c0_7 = arith.constant 0 : index
    %8 = vector.load %arg7[%c0_6, %c0_7] : memref<128x8xf32, #tpu.memory_space<vmem>>, vector<128x8xf32>
    tpu.vector_store %arg7[%c0_6, %c0_7], %7 {strides = array<i32>} : memref<128x8xf32, #tpu.memory_space<vmem>>, vector<128x8xf32>,
    %c0_i32_8 = arith.constant 0 : i32
    %9 = arith.cmpi eq, %arg1, %c0_i32_8 : i32
    %10 = arith.extui %9 : i1 to i32
    %c0_i32_9 = arith.constant 0 : i32
    %11 = arith.cmpi ne, %10, %c0_i32_9 : i32
    scf.if %11 {
      %c0_10 = arith.constant 0 : index
      %c0_11 = arith.constant 0 : index
      %12 = vector.load %arg7[%c0_10, %c0_11] : memref<128x8xf32, #tpu.memory_space<vmem>>, vector<128x8xf32>
      %c0_12 = arith.constant 0 : index
      %c0_13 = arith.constant 0 : index
      %13 = vector.load %arg4[%c0_12, %c0_13] : memref<1x8xf32, #tpu.memory_space<vmem>>, vector<1x8xf32>
      %14 = vector.broadcast %13 : vector<1x8xf32> to vector<128x8xf32>
      %15 = arith.addf %12, %14 : vector<128x8xf32>
      %c0_14 = arith.constant 0 : index
      %c0_15 = arith.constant 0 : index
      %16 = vector.load %arg5[%c0_14, %c0_15] : memref<128x8xf32, #tpu.memory_space<vmem>>, vector<128x8xf32>
      %17 = arith.addf %15, %16 : vector<128x8xf32>
      %c0_16 = arith.constant 0 : index
      %c0_17 = arith.constant 0 : index
      %18 = vector.load %arg6[%c0_16, %c0_17] : memref<128x8xf32, #tpu.memory_space<vmem>>, vector<128x8xf32>
      tpu.vector_store %arg6[%c0_16, %c0_17], %17 {strides = array<i32>} : memref<128x8xf32, #tpu.memory_space<vmem>>, vector<128x8xf32>,
    } else {
    }
    return
  }
  func.func @transform_0(%arg0: i32, %arg1: i32) -> (i32, i32) {
    %c0_i32 = arith.constant 0 : i32
    return %arg0, %arg1 : i32, i32
  }
  func.func @transform_1(%arg0: i32, %arg1: i32) -> (i32, i32) {
    %c0_i32 = arith.constant 0 : i32
    %c0_i32_0 = arith.constant 0 : i32
    return %arg1, %c0_i32 : i32, i32
  }
  func.func @transform_2(%arg0: i32, %arg1: i32) -> (i32, i32) {
    %c0_i32 = arith.constant 0 : i32
    %c0_i32_0 = arith.constant 0 : i32
    %c0_i32_1 = arith.constant 0 : i32
    return %c0_i32, %c0_i32_0 : i32, i32
  }
  func.func @transform_3(%arg0: i32, %arg1: i32) -> (i32, i32) {
    %c0_i32 = arith.constant 0 : i32
    %c0_i32_0 = arith.constant 0 : i32
    return %arg0, %c0_i32 : i32, i32
  }
  func.func @transform_4(%arg0: i32, %arg1: i32) -> (i32, i32) {
    %c0_i32 = arith.constant 0 : i32
    %c0_i32_0 = arith.constant 0 : i32
    return %arg0, %c0_i32 : i32, i32
  }
}

</mosaic_0001>

<bundles_post_ra>
// kernel: tpu_custom_call.1
= control target key start
LH: loop header
LB: loop body
LE: loop exit
PB: predicated region body
PF: predicated region fallthrough
CT: control target
= control target key end

     0   :  { %vm172_vm0 = vcmask 1043456   ;;  %vm22_vm1 = vcmask 64512   ;;  %v434_v6 = vmov 0.0   ;;  %vm147_vm2 = vcmask 588800   ;;  %s672_s1 = inlined_call_operand.vmem [shape: bf16[72,8], index: 1, kind: input, shape index: {}]   ;;  %s673_s2 = inlined_call_operand.vmem [shape: f32[1,8], index: 2, kind: input, shape index: {}]   ;;  %s674_s0 = inlined_call_operand.vmem [shape: bf16[128,72], index: 0, kind: input, shape index: {}]   ;;  %s675_s3 = inlined_call_operand.vmem [shape: f32[128,8], index: 3, kind: input, shape index: {}]   ;;  %s676_s4 = inlined_call_operand.vmem [shape: f32[128,8], index: 4, kind: output, shape index: {}]  }
   0x1   :  { %v79_v0 = vld [vmem:[%s672_s1 + $0x20] sm:$0xf]  ;;  %v416_v4 = vld [vmem:[%s672_s1 + $0x18] sm:$0xff]  ;;  %v415_v5 = vld [vmem:[%s672_s1 + $0x10] sm:$0xff]  ;;  %23 = vst.msk [vmem:[#allocation2] sm:$0xff] %vm22_vm1, %v434_v6 }
   0x2   :  { %v137_v1 = vunpack.c.l.b16 %v79_v0  ;;  %24 = vst.msk [vmem:[#allocation2 + $0x8] sm:$0xff] %vm22_vm1, %v434_v6  ;;  %v414_v7 = vld [vmem:[%s672_s1 + $0x8] sm:$0xff]  ;;  %v413_v8 = vld [vmem:[%s672_s1] sm:$0xff]  ;;  %v407_v10 = vld [vmem:[%s674_s0 + $0x10] sm:$0xff] }
   0x3   :  { %25 = vst.msk [vmem:[#allocation2 + $0x10] sm:$0xff] %vm22_vm1, %v434_v6  ;;  %v405_v9 = vld [vmem:[%s674_s0] sm:$0xff]  ;;  %v411_v12 = vld [vmem:[%s674_s0 + $0x30] sm:$0xff]  ;;  %v406_v13 = vld [vmem:[%s674_s0 + $0x8] sm:$0xff] }
   0x4   :  { %v142_v2 = vpack.c.b16 %v137_v1, %v137_v1  ;;  %26 = vst.msk [vmem:[#allocation2 + $0x18] sm:$0xff] %vm22_vm1, %v434_v6  ;;  %v409_v11 = vld [vmem:[%s674_s0 + $0x20] sm:$0xff]  ;;  %v408_v14 = vld [vmem:[%s674_s0 + $0x18] sm:$0xff]  ;;  %v410_v15 = vld [vmem:[%s674_s0 + $0x28] sm:$0xff] }
   0x5   :  { %27 = vst.msk [vmem:[#allocation2 + $0x20] sm:$0xff] %vm22_vm1, %v434_v6  ;;  %v412_v16 = vld [vmem:[%s674_s0 + $0x38] sm:$0xff]  ;;  %v528_v27 = vld [vmem:[%s673_s2] ss:$0 sm:$0xff]  ;;  %v298_v63 = vld [vmem:[%s675_s3 + $0x8] sm:$0xff] }
   0x6   :  { %v174_v3 = vsel %vm172_vm0, %v142_v2, 0  ;;  %28 = vst.msk [vmem:[#allocation2 + $0x28] sm:$0xff] %vm22_vm1, %v434_v6  ;;  %v297_v37 = vld [vmem:[%s675_s3] sm:$0xff] }
   0x7   :  { %179 = vmatpush.bf16.msra.mxu0 %v174_v3  ;;  %417 = vmatpush.bf16.msra.mxu1 %v174_v3  ;;  %29 = vst.msk [vmem:[#allocation2 + $0x30] sm:$0xff] %vm22_vm1, %v434_v6  ;;  %v301_v40 = vld [vmem:[%s675_s3 + $0x20] sm:$0xff] }
   0x8   :  { %418 = vmatpush.bf16.msra.mxu2 %v174_v3  ;;  %419 = vmatpush.bf16.msra.mxu3 %v174_v3  ;;  %30 = vst.msk [vmem:[#allocation2 + $0x38] sm:$0xff] %vm22_vm1, %v434_v6  ;;  %v39_v17 = vld [vmem:[#allocation2] sm:$0xff]  ;;  %v302_v3 = vld [vmem:[%s675_s3 + $0x28] sm:$0xff] }
   0x9   :  { %31 = vst.msk [vmem:[#allocation2 + $0x40] sm:$0xff] %vm22_vm1, %v434_v6  ;;  %v40_v25 = vld [vmem:[#allocation2 + $0x8] sm:$0xff]  ;;  %v305_v55 = vld [vmem:[%s675_s3 + $0x40] sm:$0xff] }
   0xa   :  { %32 = vst.msk [vmem:[#allocation2 + $0x48] sm:$0xff] %vm22_vm1, %v434_v6  ;;  %v41_v46 = vld [vmem:[#allocation2 + $0x10] sm:$0xff]  ;;  %v309_v60 = vld [vmem:[%s675_s3 + $0x60] sm:$0xff] }
   0xb   :  { %180 = vmatpush.bf16.msra.mxu0 %v416_v4  ;;  %420 = vmatpush.bf16.msra.mxu1 %v416_v4  ;;  %33 = vst.msk [vmem:[#allocation2 + $0x50] sm:$0xff] %vm22_vm1, %v434_v6 }
   0xc   :  { %421 = vmatpush.bf16.msra.mxu2 %v416_v4  ;;  %422 = vmatpush.bf16.msra.mxu3 %v416_v4  ;;  %34 = vst.msk [vmem:[#allocation2 + $0x58] sm:$0xff] %vm22_vm1, %v434_v6  ;;  %v43_v18 = vld [vmem:[#allocation2 + $0x20] sm:$0xff] }
   0xd   :  { %35 = vst.msk [vmem:[#allocation2 + $0x60] sm:$0xff] %vm22_vm1, %v434_v6  ;;  %v44_v26 = vld [vmem:[#allocation2 + $0x28] sm:$0xff] }
   0xe   :  { %36 = vst.msk [vmem:[#allocation2 + $0x68] sm:$0xff] %vm22_vm1, %v434_v6  ;;  %v45_v47 = vld [vmem:[#allocation2 + $0x30] sm:$0xff] }
   0xf   :  { %181 = vmatpush.bf16.msra.mxu0 %v415_v5  ;;  %423 = vmatpush.bf16.msra.mxu1 %v415_v5  ;;  %37 = vst.msk [vmem:[#allocation2 + $0x70] sm:$0xff] %vm22_vm1, %v434_v6 }
  0x10   :  { %424 = vmatpush.bf16.msra.mxu2 %v415_v5  ;;  %425 = vmatpush.bf16.msra.mxu3 %v415_v5  ;;  %38 = vst.msk [vmem:[#allocation2 + $0x78] sm:$0xff] %vm22_vm1, %v434_v6  ;;  %v47_v23 = vld [vmem:[#allocation2 + $0x40] sm:$0xff] }
  0x11   :  { %v48_v43 = vld [vmem:[#allocation2 + $0x48] sm:$0xff] }
  0x12   :  { %v49_v6 = vld [vmem:[#allocation2 + $0x50] sm:$0xff] }
  0x13   :  { %182 = vmatpush.bf16.msra.mxu0 %v414_v7  ;;  %426 = vmatpush.bf16.msra.mxu1 %v414_v7 }
  0x14   :  { %427 = vmatpush.bf16.msra.mxu2 %v414_v7  ;;  %428 = vmatpush.bf16.msra.mxu3 %v414_v7  ;;  %v51_v24 = vld [vmem:[#allocation2 + $0x60] sm:$0xff] }
  0x15   :  { %v52_v44 = vld [vmem:[#allocation2 + $0x68] sm:$0xff] }
  0x16   :  { %v53_v7 = vld [vmem:[#allocation2 + $0x70] sm:$0xff] }
  0x17   :  { %183 = vmatpush.bf16.msra.mxu0 %v413_v8  ;;  %429 = vmatpush.bf16.msra.mxu1 %v413_v8 }
  0x18   :  { %430 = vmatpush.bf16.msra.mxu2 %v413_v8  ;;  %431 = vmatpush.bf16.msra.mxu3 %v413_v8 }
  0x1a   :  { %397 = vmatmul.msk.bf16.vlgmr.msra.gmra.mxu0 %vm147_vm2, %v405_v9  ;;  %399 = vmatmul.msk.bf16.vlgmr.msra.gmra.mxu1 %vm147_vm2, %v407_v10  ;;  %v42_v9 = vld [vmem:[#allocation2 + $0x18] sm:$0xff] }
  0x1b   :  { %401 = vmatmul.msk.bf16.vlgmr.msra.gmra.mxu2 %vm147_vm2, %v409_v11  ;;  %403 = vmatmul.msk.bf16.vlgmr.msra.gmra.mxu3 %vm147_vm2, %v411_v12  ;;  %v46_v10 = vld [vmem:[#allocation2 + $0x38] sm:$0xff] }
  0x2a   :  { %398 = vmatmul.msk.bf16.gmra.mxu0 %vm147_vm2, %v406_v13  ;;  %400 = vmatmul.msk.bf16.gmra.mxu1 %vm147_vm2, %v408_v14 }
  0x2b   :  { %402 = vmatmul.msk.bf16.gmra.mxu2 %vm147_vm2, %v410_v15  ;;  %404 = vmatmul.msk.bf16.gmra.mxu3 %vm147_vm2, %v412_v16 }
  0x97   :  { %v185_v19 = vpop.f32.mrf.mxu0  ;;  %v195_v20 = vpop.f32.mrf.mxu1 }
  0x98   :  { %v225_v21 = vadd.f32 %v185_v19, %v39_v17  ;;  %v229_v22 = vadd.f32 %v195_v20, %v43_v18  ;;  %v306_v19 = vld [vmem:[%s675_s3 + $0x48] sm:$0xff] }
  0x9a   :  { %242 = vst.msk [vmem:[#allocation2] sm:$0xff] %vm22_vm1, %v225_v21 }
  0x9b   :  { %246 = vst.msk [vmem:[#allocation2 + $0x20] sm:$0xff] %vm22_vm1, %v229_v22 }
  0x9e   :  { %v205_v28 = vpop.f32.mrf.mxu2  ;;  %v215_v29 = vpop.f32.mrf.mxu3 }
  0x9f   :  { %v233_v30 = vadd.f32 %v205_v28, %v47_v23  ;;  %v237_v31 = vadd.f32 %v215_v29, %v51_v24  ;;  %v187_v32 = vpop.f32.mrf.mxu0  ;;  %v197_v33 = vpop.f32.mrf.mxu1  ;;  %v310_v24 = vld [vmem:[%s675_s3 + $0x68] sm:$0xff]  ;;  %v299_v28 = vld [vmem:[%s675_s3 + $0x10] sm:$0xff] }
  0xa0   :  { %v226_v34 = vadd.f32 %v187_v32, %v40_v25  ;;  %v230_v35 = vadd.f32 %v197_v33, %v44_v26  ;;  %v303_v32 = vld [vmem:[%s675_s3 + $0x30] sm:$0xff] }
  0xa1   :  { %v261_v36 = vld [vmem:[#allocation2] sm:$0xff]  ;;  %250 = vst.msk [vmem:[#allocation2 + $0x40] sm:$0xff] %vm22_vm1, %v233_v30 }
  0xa2   :  { %v281_v38 = vadd.f32 %v528_v27, %v261_v36  ;;  %v265_v39 = vld [vmem:[#allocation2 + $0x20] sm:$0xff]  ;;  %254 = vst.msk [vmem:[#allocation2 + $0x60] sm:$0xff] %vm22_vm1, %v237_v31  ;;  %v54_v36 = vld [vmem:[#allocation2 + $0x78] sm:$0xff] }
  0xa3   :  { %v285_v41 = vadd.f32 %v528_v27, %v265_v39  ;;  %243 = vst.msk [vmem:[#allocation2 + $0x8] sm:$0xff] %vm22_vm1, %v226_v34 }
  0xa4   :  { %v313_v42 = vadd.f32 %v297_v37, %v281_v38  ;;  %247 = vst.msk [vmem:[#allocation2 + $0x28] sm:$0xff] %vm22_vm1, %v230_v35  ;;  %v50_v35 = vld [vmem:[#allocation2 + $0x58] sm:$0xff] }
  0xa5   :  { %v317_v45 = vadd.f32 %v301_v40, %v285_v41 }
  0xa6   :  { %329 = vst.msk [vmem:[%s676_s4] sm:$0xff] %vm22_vm1, %v313_v42  ;;  %v207_v48 = vpop.f32.mrf.mxu2  ;;  %v217_v49 = vpop.f32.mrf.mxu3 }
  0xa7   :  { %333 = vst.msk [vmem:[%s676_s4 + $0x20] sm:$0xff] %vm22_vm1, %v317_v45  ;;  %v234_v50 = vadd.f32 %v207_v48, %v48_v43  ;;  %v238_v51 = vadd.f32 %v217_v49, %v52_v44  ;;  %v190_v52 = vpop.f32.mrf.mxu0  ;;  %v200_v53 = vpop.f32.mrf.mxu1  ;;  %v307_v44 = vld [vmem:[%s675_s3 + $0x50] sm:$0xff] }
  0xa8   :  { %v269_v54 = vld [vmem:[#allocation2 + $0x40] sm:$0xff]  ;;  %v227_v56 = vadd.f32 %v190_v52, %v41_v46  ;;  %v231_v57 = vadd.f32 %v200_v53, %v45_v47  ;;  %v311_v47 = vld [vmem:[%s675_s3 + $0x70] sm:$0xff] }
  0xa9   :  { %v289_v58 = vadd.f32 %v528_v27, %v269_v54  ;;  %v273_v59 = vld [vmem:[#allocation2 + $0x60] sm:$0xff]  ;;  %251 = vst.msk [vmem:[#allocation2 + $0x48] sm:$0xff] %vm22_vm1, %v234_v50  ;;  %v300_v50 = vld [vmem:[%s675_s3 + $0x18] sm:$0xff] }
  0xaa   :  { %v293_v61 = vadd.f32 %v528_v27, %v273_v59  ;;  %v262_v62 = vld [vmem:[#allocation2 + $0x8] sm:$0xff]  ;;  %255 = vst.msk [vmem:[#allocation2 + $0x68] sm:$0xff] %vm22_vm1, %v238_v51  ;;  %v304_v54 = vld [vmem:[%s675_s3 + $0x38] sm:$0xff] }
  0xab   :  { %v321_v0 = vadd.f32 %v305_v55, %v289_v58  ;;  %v282_v1 = vadd.f32 %v528_v27, %v262_v62  ;;  %v266_v2 = vld [vmem:[#allocation2 + $0x28] sm:$0xff]  ;;  %244 = vst.msk [vmem:[#allocation2 + $0x10] sm:$0xff] %vm22_vm1, %v227_v56 }
  0xac   :  { %v325_v4 = vadd.f32 %v309_v60, %v293_v61  ;;  %v286_v5 = vadd.f32 %v528_v27, %v266_v2  ;;  %248 = vst.msk [vmem:[#allocation2 + $0x30] sm:$0xff] %vm22_vm1, %v231_v57  ;;  %v308_v60 = vld [vmem:[%s675_s3 + $0x58] sm:$0xff] }
  0xad   :  { %337 = vst.msk [vmem:[%s676_s4 + $0x40] sm:$0xff] %vm22_vm1, %v321_v0  ;;  %v314_v8 = vadd.f32 %v298_v63, %v282_v1  ;;  %v312_v63 = vld [vmem:[%s675_s3 + $0x78] sm:$0xff] }
  0xae   :  { %341 = vst.msk [vmem:[%s676_s4 + $0x60] sm:$0xff] %vm22_vm1, %v325_v4  ;;  %v318_v11 = vadd.f32 %v302_v3, %v286_v5  ;;  %v210_v12 = vpop.f32.mrf.mxu2  ;;  %v220_v13 = vpop.f32.mrf.mxu3 }
  0xaf   :  { %330 = vst.msk [vmem:[%s676_s4 + $0x8] sm:$0xff] %vm22_vm1, %v314_v8  ;;  %v235_v14 = vadd.f32 %v210_v12, %v49_v6  ;;  %v239_v15 = vadd.f32 %v220_v13, %v53_v7  ;;  %v192_v16 = vpop.f32.mrf.mxu0  ;;  %v202_v17 = vpop.f32.mrf.mxu1 }
  0xb0   :  { %334 = vst.msk [vmem:[%s676_s4 + $0x28] sm:$0xff] %vm22_vm1, %v318_v11  ;;  %v270_v18 = vld [vmem:[#allocation2 + $0x48] sm:$0xff]  ;;  %v228_v20 = vadd.f32 %v192_v16, %v42_v9  ;;  %v232_v21 = vadd.f32 %v202_v17, %v46_v10 }
  0xb1   :  { %v290_v22 = vadd.f32 %v528_v27, %v270_v18  ;;  %v274_v23 = vld [vmem:[#allocation2 + $0x68] sm:$0xff]  ;;  %252 = vst.msk [vmem:[#allocation2 + $0x50] sm:$0xff] %vm22_vm1, %v235_v14 }
  0xb2   :  { %v294_v25 = vadd.f32 %v528_v27, %v274_v23  ;;  %v263_v26 = vld [vmem:[#allocation2 + $0x10] sm:$0xff]  ;;  %256 = vst.msk [vmem:[#allocation2 + $0x70] sm:$0xff] %vm22_vm1, %v239_v15 }
  0xb3   :  { %v322_v29 = vadd.f32 %v306_v19, %v290_v22  ;;  %v283_v30 = vadd.f32 %v528_v27, %v263_v26  ;;  %v267_v31 = vld [vmem:[#allocation2 + $0x30] sm:$0xff]  ;;  %245 = vst.msk [vmem:[#allocation2 + $0x18] sm:$0xff] %vm22_vm1, %v228_v20 }
  0xb4   :  { %v326_v33 = vadd.f32 %v310_v24, %v294_v25  ;;  %v287_v34 = vadd.f32 %v528_v27, %v267_v31  ;;  %249 = vst.msk [vmem:[#allocation2 + $0x38] sm:$0xff] %vm22_vm1, %v232_v21 }
  0xb5   :  { %338 = vst.msk [vmem:[%s676_s4 + $0x48] sm:$0xff] %vm22_vm1, %v322_v29  ;;  %v315_v37 = vadd.f32 %v299_v28, %v283_v30 }
  0xb6   :  { %342 = vst.msk [vmem:[%s676_s4 + $0x68] sm:$0xff] %vm22_vm1, %v326_v33  ;;  %v319_v38 = vadd.f32 %v303_v32, %v287_v34  ;;  %v212_v39 = vpop.f32.mrf.mxu2  ;;  %v222_v40 = vpop.f32.mrf.mxu3 }
  0xb7   :  { %331 = vst.msk [vmem:[%s676_s4 + $0x10] sm:$0xff] %vm22_vm1, %v315_v37  ;;  %v236_v41 = vadd.f32 %v212_v39, %v50_v35  ;;  %v240_v42 = vadd.f32 %v222_v40, %v54_v36 }
  0xb8   :  { %335 = vst.msk [vmem:[%s676_s4 + $0x30] sm:$0xff] %vm22_vm1, %v319_v38  ;;  %v271_v43 = vld [vmem:[#allocation2 + $0x50] sm:$0xff] }
  0xb9   :  { %v291_v45 = vadd.f32 %v528_v27, %v271_v43  ;;  %v275_v46 = vld [vmem:[#allocation2 + $0x70] sm:$0xff]  ;;  %253 = vst.msk [vmem:[#allocation2 + $0x58] sm:$0xff] %vm22_vm1, %v236_v41 }
  0xba   :  { %v295_v48 = vadd.f32 %v528_v27, %v275_v46  ;;  %v264_v49 = vld [vmem:[#allocation2 + $0x18] sm:$0xff]  ;;  %257 = vst.msk [vmem:[#allocation2 + $0x78] sm:$0xff] %vm22_vm1, %v240_v42 }
  0xbb   :  { %v323_v51 = vadd.f32 %v307_v44, %v291_v45  ;;  %v284_v52 = vadd.f32 %v528_v27, %v264_v49  ;;  %v268_v53 = vld [vmem:[#allocation2 + $0x38] sm:$0xff] }
  0xbc   :  { %v327_v55 = vadd.f32 %v311_v47, %v295_v48  ;;  %v288_v56 = vadd.f32 %v528_v27, %v268_v53 }
  0xbd   :  { %339 = vst.msk [vmem:[%s676_s4 + $0x50] sm:$0xff] %vm22_vm1, %v323_v51  ;;  %v316_v57 = vadd.f32 %v300_v50, %v284_v52 }
  0xbe   :  { %343 = vst.msk [vmem:[%s676_s4 + $0x70] sm:$0xff] %vm22_vm1, %v327_v55  ;;  %v320_v58 = vadd.f32 %v304_v54, %v288_v56 }
  0xbf   :  { %332 = vst.msk [vmem:[%s676_s4 + $0x18] sm:$0xff] %vm22_vm1, %v316_v57 }
  0xc0   :  { %336 = vst.msk [vmem:[%s676_s4 + $0x38] sm:$0xff] %vm22_vm1, %v320_v58  ;;  %v272_v59 = vld [vmem:[#allocation2 + $0x58] sm:$0xff] }
  0xc1   :  { %v292_v61 = vadd.f32 %v528_v27, %v272_v59  ;;  %v276_v62 = vld [vmem:[#allocation2 + $0x78] sm:$0xff] }
  0xc2   :  { %v296_v0 = vadd.f32 %v528_v27, %v276_v62 }
  0xc3   :  { %v324_v1 = vadd.f32 %v308_v60, %v292_v61 }
  0xc4   :  { %v328_v2 = vadd.f32 %v312_v63, %v296_v0 }
  0xc5   :  { %340 = vst.msk [vmem:[%s676_s4 + $0x58] sm:$0xff] %vm22_vm1, %v324_v1 }
  0xc6   :  { %344 = vst.msk [vmem:[%s676_s4 + $0x78] sm:$0xff] %vm22_vm1, %v328_v2 }

</bundles_post_ra>
